<compile_context>
chip_gen: v6e
topology: v6e:2x2x1
jax: 0.10.0
libtpu: 0.0.40
codegen_flags: <defaults>
</compile_context>

<pallas_src>
import jax
import jax.numpy as jnp
from jax import lax
from jax.experimental import pallas as pl
from jax.experimental.pallas import tpu as pltpu


def _reg_l1_kernel(ind_ref, feat_ref, mask_ref, target_ref, partial_ref, acc_ref):
    """Grid: (batch, hw_tile).  Batch is parallel, hw_tile is a reduction.

    ind_ref:     VMEM (1, 1, K) int32    gather indices into the H*W axis
    feat_ref:    VMEM (1, C, HWt)        this batch's feature-map tile (NCHW view)
    mask_ref:    VMEM (1, 1, K) f32      object mask (0/1)
    target_ref:  VMEM (1, C, K) f32      regression targets, C on sublanes
    partial_ref: VMEM (1, 1, 128) f32    per-batch partial sum of |pred-t|*m
    acc_ref:     VMEM (C, K) f32         gathered-pred accumulator (scratch)
    """
    t = pl.program_id(1)
    hw_tile = feat_ref.shape[2]

    @pl.when(t == 0)
    def _():
        acc_ref[...] = jnp.zeros_like(acc_ref)

    # Shift the gather indices into this tile's local coordinate frame and
    # build the one-hot directly as (HW_TILE, K).  Indices outside this tile
    # (including negative locals) never match the iota -> contribute zero.
    idx_local = ind_ref[0] - t * hw_tile                              # (1, K)
    iota_hw = lax.broadcasted_iota(jnp.int32, (hw_tile, idx_local.shape[1]), 0)
    onehot = (iota_hw == idx_local).astype(feat_ref.dtype)            # (HWt, K)

    # pred[c, k] += sum_h feat[c, h] * onehot[h, k]   (canonical MXU matmul).
    acc_ref[...] += lax.dot_general(
        feat_ref[0], onehot,
        dimension_numbers=(((1,), (0,)), ((), ())),
        preferred_element_type=jnp.float32)                           # (C, K)

    @pl.when(t == pl.num_programs(1) - 1)
    def _():
        # mask is 0/1, so |p*m - t*m| == |p - t| * m; reduce over C first so
        # the mask multiply costs K ops and the sublane reduce rides the XLU.
        pred = acc_ref[...]                                           # (C, K)
        col = jnp.sum(jnp.abs(pred - target_ref[0]), axis=0, keepdims=True)
        partial = jnp.sum(col * mask_ref[0])
        # Lane-dense (unmasked) store of this batch's partial sum.
        partial_ref[...] = jnp.full(partial_ref.shape, partial, jnp.float32)


def _pick_hw_tile(hw, max_tile=2048):
    """Largest lane-aligned divisor of hw that is <= max_tile (else hw)."""
    if hw <= max_tile:
        return hw
    for cand in range(max_tile - max_tile % 128, 0, -128):
        if hw % cand == 0:
            return cand
    return hw  # no lane-aligned divisor; fall back to a single full-HW tile


def reg_l1_loss(output, mask, ind, target, *, hw_tile=None):
    """JAX wrapper matching RegL1Loss.forward(output, mask, ind, target)."""
    B, C, H, W = output.shape
    K = ind.shape[1]
    HW = H * W

    if hw_tile is None:
        hw_tile = _pick_hw_tile(HW)
    assert HW % hw_tile == 0, "hw_tile must divide H*W"
    assert hw_tile % 128 == 0 or hw_tile == HW, "hw_tile must be lane aligned"
    num_hw_tiles = HW // hw_tile

    # Free view: NCHW -> (B, C, H*W).  No transpose / dtype pass over the
    # feature map in HBM before the kernel; it streams in its native dtype.
    feat = output.reshape(B, C, HW)
    ind_i = ind.astype(jnp.int32).reshape(B, 1, K)                    # lane-dense K
    mask_f = mask.astype(jnp.float32).reshape(B, 1, K)
    target_ck = jnp.transpose(target.astype(jnp.float32), (0, 2, 1))  # (B,C,K), tiny

    # TODO(synk): for large-C heads (C >= ~64) with very large HW, switch feat
    #   to memory_space=pl.ANY + manual double-buffered per-index DMA gathers
    #   (make_async_copy + SemaphoreType.DMA) so HBM traffic drops to ~B*K*C.
    # TODO(synk): M = C (2-4 for CenterNet heads) under-fills the MXU rows;
    #   fuse multiple regression heads' channels into one call when available.
    # TODO(synk): on v7x with B == 1, shard K or the HW tiles across the two
    #   TensorCores (extra parallel axis + per-core partials) instead of
    #   relying on the batch axis alone; sweep pipeline_mode=pl.Buffered(3) on
    #   the feat BlockSpec if the per-tile DMA is still exposed.
    partials = pl.pallas_call(
        _reg_l1_kernel,
        out_shape=jax.ShapeDtypeStruct((B, 1, 128), jnp.float32),
        grid_spec=pltpu.PrefetchScalarGridSpec(
            num_scalar_prefetch=0,
            grid=(B, num_hw_tiles),
            in_specs=[
                pl.BlockSpec((1, 1, K), lambda b, t: (b, 0, 0)),        # ind
                pl.BlockSpec((1, C, hw_tile), lambda b, t: (b, 0, t)),  # feat tile
                pl.BlockSpec((1, 1, K), lambda b, t: (b, 0, 0)),        # mask
                pl.BlockSpec((1, C, K), lambda b, t: (b, 0, 0)),        # target
            ],
            out_specs=pl.BlockSpec((1, 1, 128), lambda b, t: (b, 0, 0)),
            scratch_shapes=[pltpu.VMEM((C, K), jnp.float32)],
        ),
        compiler_params=pltpu.CompilerParams(
            dimension_semantics=("parallel", "arbitrary")),
    )(ind_i, feat, mask_f, target_ck)

    numer = jnp.sum(partials[:, 0, 0])
    # torch sums the mask after expanding it over the C channels -> * C.
    denom = jnp.sum(mask_f) * float(C) + 0.0001
    return numer / denom


def _reference(output, mask, ind, target):
    """Pure-JAX reproduction of the PyTorch forward, for verification."""
    B, C, H, W = output.shape
    feat = jnp.transpose(output, (0, 2, 3, 1)).reshape(B, H * W, C)
    idx = ind[:, :, None].astype(jnp.int32)
    pred = jnp.take_along_axis(
        feat, jnp.broadcast_to(idx, (B, ind.shape[1], C)), axis=1)
    m = jnp.broadcast_to(mask.astype(jnp.float32)[:, :, None], pred.shape)
    loss = jnp.sum(jnp.abs(pred * m - target * m))
    return loss / (jnp.sum(m) + 0.0001)


if __name__ == "__main__":
    B, C, H, W, K = 2, 4, 16, 16, 8

    key = jax.random.PRNGKey(0)
    k1, k2, k3, k4 = jax.random.split(key, 4)
    output = jax.random.normal(k1, (B, C, H, W), dtype=jnp.float32)
    ind = jax.random.randint(k2, (B, K), 0, H * W, dtype=jnp.int32)
    mask = (jax.random.uniform(k3, (B, K)) > 0.3).astype(jnp.float32)
    target = jax.random.normal(k4, (B, K, C), dtype=jnp.float32)

    # hw_tile=128 so the small test shape (HW=256) exercises the multi-tile
    # accumulation path (2 HW tiles per batch element).
    loss = jax.block_until_ready(
        reg_l1_loss(output, mask, ind, target, hw_tile=128))
    ref = jax.block_until_ready(_reference(output, mask, ind, target))

    if not jnp.allclose(loss, ref, rtol=1e-5, atol=1e-5):
        raise AssertionError(f"mismatch: pallas={loss} ref={ref}")
    print("KERNEL_OK")
</pallas_src>

<mosaic_0001>
module attributes {stable_mosaic.version = 11 : i64} {
  func.func @_reg_l1_kernel(%arg0: i32, %arg1: i32, %arg2: memref<1x1x8xi32, #tpu.memory_space<vmem>>, %arg3: memref<1x4x128xf32, #tpu.memory_space<vmem>>, %arg4: memref<1x1x8xf32, #tpu.memory_space<vmem>>, %arg5: memref<1x4x8xf32, #tpu.memory_space<vmem>>, %arg6: memref<1x1x128xf32, #tpu.memory_space<vmem>>, %arg7: memref<4x8xf32, #tpu.memory_space<vmem>>) attributes {dimension_semantics = [#tpu.dimension_semantics<parallel>, #tpu.dimension_semantics<arbitrary>], iteration_bounds = array<i64: 2, 2>, scalar_prefetch = 0 : i64, scratch_operands = 1 : i64, tpu.core_type = #tpu.core_type<tc>, window_params = [{transform_indices = @transform_0, window_bounds = array<i64: 1, 1, 8>}, {transform_indices = @transform_1, window_bounds = array<i64: 1, 4, 128>}, {transform_indices = @transform_2, window_bounds = array<i64: 1, 1, 8>}, {transform_indices = @transform_3, window_bounds = array<i64: 1, 4, 8>}, {transform_indices = @transform_4, window_bounds = array<i64: 1, 1, 128>}]} {
    %c0_i32 = arith.constant 0 : i32
    %0 = arith.cmpi eq, %arg1, %c0_i32 : i32
    %1 = arith.extui %0 : i1 to i32
    %c0_i32_0 = arith.constant 0 : i32
    %2 = arith.cmpi ne, %1, %c0_i32_0 : i32
    scf.if %2 {
      %cst_11 = arith.constant 0.000000e+00 : f32
      %22 = vector.broadcast %cst_11 : f32 to vector<4x8xf32>
      %c0_12 = arith.constant 0 : index
      %c0_13 = arith.constant 0 : index
      %23 = vector.load %arg7[%c0_12, %c0_13] : memref<4x8xf32, #tpu.memory_space<vmem>>, vector<4x8xf32>
      tpu.vector_store %arg7[%c0_12, %c0_13], %22 {strides = array<i32>} : memref<4x8xf32, #tpu.memory_space<vmem>>, vector<4x8xf32>,
    } else {
    }
    %c0 = arith.constant 0 : index
    %c0_1 = arith.constant 0 : index
    %c0_2 = arith.constant 0 : index
    %3 = vector.load %arg2[%c0, %c0_1, %c0_2] : memref<1x1x8xi32, #tpu.memory_space<vmem>>, vector<1x1x8xi32>
    %4 = vector.shape_cast %3 : vector<1x1x8xi32> to vector<1x8xi32>
    %c128_i32 = arith.constant 128 : i32
    %5 = arith.muli %arg1, %c128_i32 : i32
    %6 = vector.broadcast %5 : i32 to vector<1x8xi32>
    %7 = arith.subi %4, %6 : vector<1x8xi32>
    %8 = tpu.iota {dimensions = array<i32: 0>} : vector<128x8xi32>
    %9 = vector.broadcast %7 : vector<1x8xi32> to vector<128x8xi32>
    %10 = arith.cmpi eq, %8, %9 : vector<128x8xi32>
    %11 = arith.extui %10 : vector<128x8xi1> to vector<128x8xi32>
    %12 = arith.sitofp %11 : vector<128x8xi32> to vector<128x8xf32>
    %c0_3 = arith.constant 0 : index
    %c0_4 = arith.constant 0 : index
    %13 = vector.load %arg7[%c0_3, %c0_4] : memref<4x8xf32, #tpu.memory_space<vmem>>, vector<4x8xf32>
    %c0_5 = arith.constant 0 : index
    %c0_6 = arith.constant 0 : index
    %c0_7 = arith.constant 0 : index
    %14 = vector.load %arg3[%c0_5, %c0_6, %c0_7] : memref<1x4x128xf32, #tpu.memory_space<vmem>>, vector<1x4x128xf32>
    %15 = vector.shape_cast %14 : vector<1x4x128xf32> to vector<4x128xf32>
    %cst = arith.constant dense<0.000000e+00> : vector<4x8xf32>
    %16 = tpu.matmul %15, %12, %cst {dimension_numbers = #tpu.dot_dimension_numbers<[1], [0], [0], [1], [0, 0, 1, 1], [], []>} : vector<4x128xf32>, vector<128x8xf32>, vector<4x8xf32> -> vector<4x8xf32>
    %17 = arith.addf %13, %16 : vector<4x8xf32>
    %c0_8 = arith.constant 0 : index
    %c0_9 = arith.constant 0 : index
    %18 = vector.load %arg7[%c0_8, %c0_9] : memref<4x8xf32, #tpu.memory_space<vmem>>, vector<4x8xf32>
    tpu.vector_store %arg7[%c0_8, %c0_9], %17 {strides = array<i32>} : memref<4x8xf32, #tpu.memory_space<vmem>>, vector<4x8xf32>,
    %c1_i32 = arith.constant 1 : i32
    %19 = arith.cmpi eq, %arg1, %c1_i32 : i32
    %20 = arith.extui %19 : i1 to i32
    %c0_i32_10 = arith.constant 0 : i32
    %21 = arith.cmpi ne, %20, %c0_i32_10 : i32
    scf.if %21 {
      %c0_11 = arith.constant 0 : index
      %c0_12 = arith.constant 0 : index
      %22 = vector.load %arg7[%c0_11, %c0_12] : memref<4x8xf32, #tpu.memory_space<vmem>>, vector<4x8xf32>
      %c0_13 = arith.constant 0 : index
      %c0_14 = arith.constant 0 : index
      %c0_15 = arith.constant 0 : index
      %23 = vector.load %arg5[%c0_13, %c0_14, %c0_15] : memref<1x4x8xf32, #tpu.memory_space<vmem>>, vector<1x4x8xf32>
      %24 = vector.shape_cast %23 : vector<1x4x8xf32> to vector<4x8xf32>
      %25 = arith.subf %22, %24 : vector<4x8xf32>
      %26 = math.absf %25 : vector<4x8xf32>
      %cst_16 = arith.constant dense<0.000000e+00> : vector<8xf32>
      %27 = vector.multi_reduction <add>, %26, %cst_16 [0] : vector<4x8xf32> to vector<8xf32>
      %28 = vector.shape_cast %27 : vector<8xf32> to vector<1x8xf32>
      %c0_17 = arith.constant 0 : index
      %c0_18 = arith.constant 0 : index
      %c0_19 = arith.constant 0 : index
      %29 = vector.load %arg4[%c0_17, %c0_18, %c0_19] : memref<1x1x8xf32, #tpu.memory_space<vmem>>, vector<1x1x8xf32>
      %30 = vector.shape_cast %29 : vector<1x1x8xf32> to vector<1x8xf32>
      %31 = arith.mulf %28, %30 : vector<1x8xf32>
      %32 = vector.shape_cast %31 : vector<1x8xf32> to vector<1x1x8xf32>
      %cst_20 = arith.constant dense<0.000000e+00> : vector<1xf32>
      %33 = vector.multi_reduction <add>, %32, %cst_20 [1, 2] : vector<1x1x8xf32> to vector<1xf32>
      %34 = vector.shape_cast %33 : vector<1xf32> to vector<1x1x1xf32>
      %35 = vector.extract %34[0, 0, 0] : f32 from vector<1x1x1xf32>
      %36 = vector.broadcast %35 : f32 to vector<1x1x128xf32>
      %c0_21 = arith.constant 0 : index
      %c0_22 = arith.constant 0 : index
      %c0_23 = arith.constant 0 : index
      %37 = vector.load %arg6[%c0_21, %c0_22, %c0_23] : memref<1x1x128xf32, #tpu.memory_space<vmem>>, vector<1x1x128xf32>
      tpu.vector_store %arg6[%c0_21, %c0_22, %c0_23], %36 {strides = array<i32>} : memref<1x1x128xf32, #tpu.memory_space<vmem>>, vector<1x1x128xf32>,
    } else {
    }
    return
  }
  func.func @transform_0(%arg0: i32, %arg1: i32) -> (i32, i32, i32) {
    %c0_i32 = arith.constant 0 : i32
    %c0_i32_0 = arith.constant 0 : i32
    %c0_i32_1 = arith.constant 0 : i32
    return %arg0, %c0_i32, %c0_i32_0 : i32, i32, i32
  }
  func.func @transform_1(%arg0: i32, %arg1: i32) -> (i32, i32, i32) {
    %c0_i32 = arith.constant 0 : i32
    %c0_i32_0 = arith.constant 0 : i32
    return %arg0, %c0_i32, %arg1 : i32, i32, i32
  }
  func.func @transform_2(%arg0: i32, %arg1: i32) -> (i32, i32, i32) {
    %c0_i32 = arith.constant 0 : i32
    %c0_i32_0 = arith.constant 0 : i32
    %c0_i32_1 = arith.constant 0 : i32
    return %arg0, %c0_i32, %c0_i32_0 : i32, i32, i32
  }
  func.func @transform_3(%arg0: i32, %arg1: i32) -> (i32, i32, i32) {
    %c0_i32 = arith.constant 0 : i32
    %c0_i32_0 = arith.constant 0 : i32
    %c0_i32_1 = arith.constant 0 : i32
    return %arg0, %c0_i32, %c0_i32_0 : i32, i32, i32
  }
  func.func @transform_4(%arg0: i32, %arg1: i32) -> (i32, i32, i32) {
    %c0_i32 = arith.constant 0 : i32
    %c0_i32_0 = arith.constant 0 : i32
    %c0_i32_1 = arith.constant 0 : i32
    return %arg0, %c0_i32, %c0_i32_0 : i32, i32, i32
  }
}

</mosaic_0001>

<bundles_post_ra>
// kernel: tpu_custom_call.1
= control target key start
LH: loop header
LB: loop body
LE: loop exit
PB: predicated region body
PF: predicated region fallthrough
CT: control target
= control target key end

     0   :  { %s1457_s0 = inlined_call_operand.hbm [shape: s32[2,1,8], index: 0, kind: input, shape index: {}]   ;;  %s1458_s1 = inlined_call_operand.hbm [shape: f32[2,4,256], index: 1, kind: input, shape index: {}]   ;;  %s1459_s2 = inlined_call_operand.vmem [shape: f32[2,1,8], index: 2, kind: input, shape index: {}]   ;;  %s1460_s3 = inlined_call_operand.hbm [shape: f32[2,4,8], index: 3, kind: input, shape index: {}]   ;;  %s1461_s4 = inlined_call_operand.hbm [shape: f32[2,1,128], index: 4, kind: output, shape index: {}]  }
   0x1   :  { %1470 = sst [smem:[#allocation20_spill]] %s1458_s1 }
   0x2   :  { %1471 = sst [smem:[#allocation21_spill]] %s1459_s2 }
   0x3   :  { %1472 = sst [smem:[#allocation22_spill]] %s1461_s4 }
   0x4   :  { %9 = vsyncpa [#allocation4], 0 }
   0x5   :  { %11 = vsyncpa [#allocation4 + $0x1], 0 }
   0x6   :  { %12 = vsyncpa [#allocation7], 0 }
   0x7   :  { %14 = vsyncpa [#allocation7 + $0x1], 0 }
   0x8   :  { %15 = vsyncpa [#allocation5], 0 }
   0x9   :  { %17 = vsyncpa [#allocation5 + $0x1], 0  ;;  %s1103_s15 = smov 0   ;;  %s1105_s16 = smov 0  }
   0xa   :  { %s1107_s17 = smov 0   ;;  %s1109_s18 = smov 0  }
   0xb   :  { %s1111_s19 = smov 0   ;;  %s1113_s20 = smov 0  }
   0xc   :  { %s1115_s21 = smov 0   ;;  %s1117_s22 = smov 0  }
   0xd   :  { %s1119_s23 = smov 0   ;;  %s1121_s24 = smov 0  }
   0xe   :  { %s1123_s25 = smov 0  }
   0xf LB: > { %1473 = sst [smem:[#allocation14_spill]] %s1048_s20  ;;  %s1157_s26 = sadd.s32 4294967295, %s1068_s25   ;;  %s1068_s25 = sphi %s1123_s25, %s23_s25   ;;  %s1064_s24 = sphi %s1121_s24, %s1508_s24   ;;  %s1060_s23 = sphi %s1119_s23, %s1500_s23   ;;  %s1056_s22 = sphi %s1117_s22, %s1507_s22   ;;  %s1052_s21 = sphi %s1115_s21, %s1499_s21   ;;  %s1048_s20 = sphi %s1113_s20, %s1498_s20   ;;  %s1044_s19 = sphi %s1111_s19, %s1506_s19   ;;  %s1040_s18 = sphi %s1109_s18, %s1505_s18   ;;  %s1036_s17 = sphi %s1107_s17, %s1504_s17   ;;  %s1032_s16 = sphi %s1105_s16, %s1503_s16   ;;  %s1028_s15 = sphi %s1103_s15, %s1502_s15  }
  0x10   : > { %1474 = sst [smem:[#allocation15_spill]] %s1052_s21  ;;  %s32_s27 = sadd.s32 1, %s1060_s23 }
  0x11   : > { %1475 = sst [smem:[#allocation16_spill]] %s1060_s23  ;;  %p33_p0 = scmp.ge.s32.totalorder %s32_s27, 2 }
  0x12   : > { %s35_s28 = sadd.s32 1, %s1064_s24  ;;  %p50_p1 = scmp.eq.s32.totalorder %s1068_s25, 0 }
  0x13   : > { %p1467_p2 = scmp.eq.s32.totalorder %s1157_s26, 0  ;;  %s1510_s27 = smov (%p33_p0, %s32_s27), 0 }
  0x14   : > { %1476 = sst [smem:[#allocation17_spill]] %s1510_s27  ;;  %s1512_s28 = smov (!%p33_p0, %s35_s28), %s1064_s24 }
  0x15   : > { %s66_s29 = ssub.s32 %s1060_s23, %s1510_s27  ;;  %s70_s30 = sadd.s32 1, %s1036_s17 }
  0x16   : > { %p37_p3 = scmp.ge.s32.totalorder %s1512_s28, 2  ;;  %p77_p4 = scmp.ne.s32.totalorder %s1036_s17, %s1032_s16 }
  0x17   : > { %p83_p5 = scmp.ne.s32.totalorder %s1032_s16, %s1028_s15  ;;  %p1466_p8 = scmp.lt.s32.totalorder %s1068_s25, 4 }
  0x18   : > { %s1514_s28 = smov (%p37_p3, %s1512_s28), 0  ;;  %p1176_p6 = por %p77_p4, %p50_p1 }
  0x19   : > { %1477 = sst [smem:[#allocation18_spill]] %s1514_s28  ;;  %p1182_p7 = por %p83_p5, %p1467_p2 }
  0x1a   : > { %s1188_s7 = ssub.s32 %s1064_s24, %s1514_s28  ;;  %s202_s9 = sand.u32 1, %s1068_s25  }
  0x1b   : > { %p40_p9 = scmp.eq.s32.totalorder %s1188_s7, 0  ;;  %s67_s8 = sor.u32 %s66_s29, %s1188_s7 }
  0x1c   : > { %p68_p10 = scmp.eq.s32.totalorder %s67_s8, 0  ;;  %s204_s10 = sand.u32 1, %s1036_s17  }
  0x1d   : > { %s640_s12 = sshll.u32 %s204_s10, 2  ;;  %s641_s13 = sshll.u32 %s1064_s24, 1 }
  0x1e   : > { %s1196_s11 = scalar_select %p68_p10, %s1036_s17, %s70_s30  }
  0x1f   : > { %s211_s14 = sadd.s32 %s1060_s23, %s641_s13  ;;  %s206_s28 = scalar_lea.vmem [#allocation6], %s640_s12 }
  0x20   : > { %s642_s15 = sshll.u32 %s211_s14, 6  ;;  %s215_s27 = sshll.u32 %s206_s28, 4  ;;  %s216_s27 = int_to_ptr.vmem [resolvable:$true] %s215_s27 }
  0x21   : > { %s1480_s1 = sld [smem:[#allocation20_spill]]  ;;  %p1207_p11 = pnand %p1466_p8, %p1176_p6 }
  0x22   : > { %p645_p12 = scmp.ge.s32.totalorder %s1068_s25, 1  ;;  %p244_p13 = scmp.lt.s32.totalorder %s1068_s25, 5 }
  0x23   : > { %s1213_s30 = scalar_lea.sflag [#allocation7], %s202_s9  ;;  %p858_p0 = pneg %p1207_p11 }
  0x24   : > { %s869_s8 = scalar_lea.vmem %s216_s27, 64  ;;  %s1070_s4 = smov [#allocation6]  }
  0x25   : > { %p870_p3 = scmp.ne.s32.totalorder %s216_s27, %s869_s8  ;;  %s874_s21 = sshll.u32 %s1070_s4, 4  ;;  %s875_s21 = int_to_ptr.vmem [resolvable:$false] %s874_s21 }
  0x26   : > { %s876_s28 = scalar_lea.vmem %s875_s21, 128  ;;  %p877_p10 = scmp.lt.s32.totalorder %s216_s27, %s875_s21 }
  0x27   : > { %s213_s2 = scalar_lea.hbm %s1480_s1, %s642_s15  ;;  %p872_p4 = pnand %p870_p3, %p858_p0 }
  0x28   : > { %p878_p6 = scmp.lt.s32.totalorder %s876_s28, %s869_s8 }
  0x29   : > { %p873_p5 = pneg %p872_p4 }
  0x2a   : > { %p879_p8 = por %p878_p6, %p877_p10 }
  0x2c   : > { %p880_p2 = pnand %p879_p8, %p873_p5 }
  0x2e   : > { %883 = shalt.err (!%p880_p2)
}
  0x2f   : > { %754 = dma.hbm_to_vmem [thread:$0]  (!%p1207_p11), %s213_s2, 64, %s216_s27, %s1213_s30  }
  0x30   : > { %p1224_p2 = pnand %p645_p12, %p244_p13  ;;  %s636_s9 = sadd.s32 4294967294, %s1068_s25  }
  0x31   : > { %s42_s10 = sadd.s32 1, %s1048_s20  ;;  %p49_p8 = scmp.ne.s32.totalorder %s1048_s20, %s1044_s19 }
  0x32   : > { %s1235_s12 = scalar_select %p40_p9, %s1048_s20, %s42_s10  }
  0x33   : > { %p1239_p0 = por %p50_p1, %p49_p8  ;;  %p55_p11 = scmp.ne.s32.totalorder %s1044_s19, %s1040_s18 }
  0x34   : > { %1483 = sst [smem:[#allocation19_spill]] %s1235_s12  ;;  %p159_p3 = scmp.eq.s32.totalorder %s1157_s26, 3 }
  0x35   : > { %p165_p12 = scmp.eq.s32.totalorder %s636_s9, 3  ;;  %p1485_p13 = scmp.eq.s32.totalorder %s1157_s26, 0 }
  0x36   : > { %s1253_s27 = sand.u32 1, %s1048_s20   ;;  %p1255_p9 = por %p159_p3, %p49_p8 }
  0x37   : > { %p1248_p4 = por %p1485_p13, %p55_p11  ;;  %p1259_p1 = por %p165_p12, %p55_p11 }
  0x38   : > { %s639_s15 = sshll.u32 %s1064_s24, 4  ;;  %s188_s29 = scalar_lea.vmem [#allocation3], %s1253_s27 }
  0x39   : > { %s1488_s14 = scalar_select %p1259_p1, 1, 0 }
  0x3a   : > { %s195_s8 = sshll.u32 %s188_s29, 4  ;;  %s193_s28 = scalar_lea.hbm %s1457_s0, %s639_s15  ;;  %s196_s8 = int_to_ptr.vmem [resolvable:$true] %s195_s8 }
  0x3b   : > { %p1489_p5 = scmp.lt.s32.totalorder %s1068_s25, 4  ;;  %s643_s10 = sshll.u32 %s1253_s27, 2 }
  0x3c   : > { %s644_s1 = sshll.u32 %s1064_s24, 6  ;;  %s186_s29 = scalar_lea.sflag [#allocation4], %s1253_s27 }
  0x3d   : > { %p1272_p10 = pnand %p1489_p5, %p1239_p0  ;;  %s1281_s20 = scalar_lea.hbm %s1460_s3, %s644_s1 }
  0x3e   : > { %s897_s15 = scalar_lea.vmem %s196_s8, 16  ;;  %s1071_s13 = smov [#allocation3]  }
  0x3f   : > { %p886_p6 = pneg %p1272_p10  ;;  %p898_p8 = scmp.ne.s32.totalorder %s196_s8, %s897_s15 }
  0x40   : > { %s902_s4 = sshll.u32 %s1071_s13, 4  ;;  %s903_s4 = int_to_ptr.vmem [resolvable:$false] %s902_s4 }
  0x41   : > { %p900_p0 = pnand %p898_p8, %p886_p6  ;;  %s904_s21 = scalar_lea.vmem %s903_s4, 32 }
  0x42   : > { %p905_p3 = scmp.lt.s32.totalorder %s196_s8, %s903_s4  ;;  %p906_p12 = scmp.lt.s32.totalorder %s904_s21, %s897_s15 }
  0x43   : > { %p901_p11 = pneg %p900_p0 }
  0x44   : > { %p907_p13 = por %p906_p12, %p905_p3 }
  0x46   : > { %p908_p5 = pnand %p907_p13, %p901_p11 }
  0x48   : > { %911 = shalt.err (!%p908_p5)
}
  0x49   : > { %751 = dma.hbm_to_vmem [thread:$0]  (!%p1272_p10), %s193_s28, 16, %s196_s8, %s186_s29  }
  0x4a   : > { %s232_s1 = scalar_lea.vmem [#allocation8], %s643_s10  ;;  %s1072_s27 = smov [#allocation8]  }
  0x4b   : > { %s239_s23 = sshll.u32 %s232_s1, 4  ;;  %s930_s13 = sshll.u32 %s1072_s27, 4  ;;  %s240_s23 = int_to_ptr.vmem [resolvable:$true] %s239_s23  ;;  %s931_s13 = int_to_ptr.vmem [resolvable:$false] %s930_s13 }
  0x4c   : > { %s925_s12 = scalar_lea.vmem %s240_s23, 64  ;;  %s932_s15 = scalar_lea.vmem %s931_s13, 128 }
  0x4d   : > { %p926_p1 = scmp.ne.s32.totalorder %s240_s23, %s925_s12  ;;  %p933_p3 = scmp.lt.s32.totalorder %s240_s23, %s931_s13 }
  0x4e   : > { %p934_p11 = scmp.lt.s32.totalorder %s932_s15, %s925_s12 }
  0x4f   : > { %p928_p8 = pnand %p926_p1, %p886_p6 }
  0x50   : > { %p935_p12 = por %p934_p11, %p933_p3 }
  0x51   : > { %p929_p0 = pneg %p928_p8 }
  0x53   : > { %p936_p13 = pnand %p935_p12, %p929_p0 }
  0x55   : > { %939 = shalt.err (!%p936_p13)
}
  0x56   : > { %757 = dma.hbm_to_vmem [thread:$0]  (!%p1272_p10), %s1281_s20, 64, %s240_s23, %s1213_s30  }
  0x57   : > { %248 = sbr.rel (%p1224_p2) target bundleno = 608 (0x260), region = 36  ;;  %s1301_s8 = sand.u32 (!%p1224_p2), 1, %s1044_s19  }
  0x58   : > { %s251_s28 = scalar_lea.sflag (!%p1224_p2), [#allocation4], %s1301_s8  ;;  %s253_s10 = scalar_lea.vmem (!%p1224_p2), [#allocation3], %s1301_s8 }
  0x5c   : > { %1011 = dma.done.wait (%p1248_p4), %s251_s28, 16  }
  0x5d   : > { %1013 = vsyncadd (%p1248_p4), %s251_s28, 4294967280  ;;  %s258_s20 = sand.u32 1, %s1157_s26   ;;  %s260_s30 = sand.u32 1, %s1032_s16  }
  0x5e   : > { %s1311_s5 = sshll.u32 %s260_s30, 2  ;;  %s259_s9 = scalar_lea.sflag [#allocation7], %s258_s20 }
  0x5f   : > { %s262_s29 = scalar_lea.vmem [#allocation6], %s1311_s5 }
  0x60   : > { %1015 = dma.done.wait (%p1182_p7), %s259_s9, 64  }
  0x61   : > { %1017 = vsyncadd (%p1182_p7), %s259_s9, 4294967232  ;;  %s647_s4 = sshll.u32 %s1301_s8, 2 }
  0x62   : > { %s1319_s21 = scalar_lea.vmem [#allocation8], %s647_s4 }
  0x63   : > { %1019 = dma.done.wait (%p1248_p4), %s259_s9, 64  }
  0x64   : > { %1021 = vsyncadd (%p1248_p4), %s259_s9, 4294967232  ;;  %p307_p2 = scmp.lt.s32.totalorder %s1056_s22, 1  ;;  %s1491_s23 = sld [smem:[#allocation21_spill]] }
  0x65   : > { %s306_s27 = scalar_lea.vmem [#allocation9], %s1301_s8  ;;  %s1492_s13 = sld [smem:[#allocation15_spill]] }
  0x66   : > { %s1327_s26 = scalar_select %p307_p2, %s1056_s22, 1 }
  0x6a   : > { %s309_s12 = scalar_lea.vmem %s1491_s23, %s1327_s26 }
  0x6b   : > { %p648_p7 = scmp.ne.s32.totalorder %s1492_s13, 0 }
  0x6d   : > { %313 = sbr.rel (%p648_p7) target bundleno = 116 (0x74), region = 52 }
  0x72   : > { %vm314_vm0 = vcmask 60416   ;;  %v1073_v0 = vmov 0.0  }
  0x73   : > { %315 = vst.msk [vmem:[#allocation2] sm:$0xf] %vm314_vm0, %v1073_v0 }
  0x74 PF: > { %v316_v1 = vld [vmem:[%s253_s10] sm:$0x1]  ;;  %s1493_s2 = sld [smem:[#allocation15_spill]]  ;;  %v320_v2 = vlaneseq  ;;  %v1074_v3 = vmov 0.0   ;;  %vm1075_vm1 = vmmov 0   ;;  %v1076_v13 = vmov 1.0  }
  0x75   : > { %703 = vmatprep.subr.mxu0 %v1074_v3  ;;  %735 = vmatprep.mubr.msk.f32.mxu0 %vm1075_vm1, %v1074_v3  ;;  %v390_v25 = vld [vmem:[%s262_s29] sm:$0xf] }
  0x76   : > { %v1338_v6 = vshrl.u32 %v320_v2, 7 }
  0x78   : > { %v336_v7 = vadd.s32 120, %v1338_v6  ;;  %v339_v8 = vsub.s32 0, %v1338_v6  ;;  %v335_v9 = vadd.s32 112, %v1338_v6  ;;  %v334_v11 = vadd.s32 104, %v1338_v6 }
  0x79   : > { %v333_v12 = vadd.s32 96, %v1338_v6  ;;  %v332_v14 = vadd.s32 88, %v1338_v6  ;;  %v331_v15 = vadd.s32 80, %v1338_v6  ;;  %v330_v16 = vadd.s32 72, %v1338_v6 }
  0x7a   : > { %s649_s15 = sshll.u32 %s1493_s2, 7  ;;  %v329_v17 = vadd.s32 64, %v1338_v6  ;;  %v328_v18 = vadd.s32 56, %v1338_v6  ;;  %v327_v19 = vadd.s32 48, %v1338_v6  ;;  %v326_v20 = vadd.s32 40, %v1338_v6  ;;  %p682_p4 = scmp.ne.s32.totalorder %s1493_s2, 1 }
  0x7b   : > { %v318_v4 = vstv %s649_s15  ;;  %v325_v21 = vadd.s32 32, %v1338_v6  ;;  %v324_v22 = vadd.s32 24, %v1338_v6  ;;  %v323_v23 = vadd.s32 16, %v1338_v6  ;;  %v389_v26 = vld [vmem:[#allocation2] sm:$0xf] }
  0x7c   : > { %v319_v5 = vsub.s32 %v316_v1, %v318_v4  ;;  %v322_v24 = vadd.s32 8, %v1338_v6 }
  0x7e   : > { %v1343_v10 = vrot.slane %v319_v5, %v339_v8 }
  0x80   : > { %vm356_vm2 = vcmp.eq.s32.totalorder %v336_v7, %v1343_v10  ;;  %vm355_vm3 = vcmp.eq.s32.totalorder %v335_v9, %v1343_v10  ;;  %vm354_vm4 = vcmp.eq.s32.totalorder %v334_v11, %v1343_v10  ;;  %vm353_vm5 = vcmp.eq.s32.totalorder %v333_v12, %v1343_v10 }
  0x81   : > { %704 = vmatpush3.msk.msra.mxu0 %vm356_vm2, %v1076_v13  ;;  %vm352_vm6 = vcmp.eq.s32.totalorder %v332_v14, %v1343_v10  ;;  %vm351_vm7 = vcmp.eq.s32.totalorder %v331_v15, %v1343_v10  ;;  %vm350_vm8 = vcmp.eq.s32.totalorder %v330_v16, %v1343_v10  ;;  %vm349_vm9 = vcmp.eq.s32.totalorder %v329_v17, %v1343_v10 }
  0x82   : > { %705 = vmatprep.subr.mxu0 %v1074_v3  ;;  %vm348_vm10 = vcmp.eq.s32.totalorder %v328_v18, %v1343_v10  ;;  %vm347_vm11 = vcmp.eq.s32.totalorder %v327_v19, %v1343_v10  ;;  %vm346_vm12 = vcmp.eq.s32.totalorder %v326_v20, %v1343_v10  ;;  %vm345_vm13 = vcmp.eq.s32.totalorder %v325_v21, %v1343_v10 }
  0x83   : > { %706 = vmatpush3.msk.msra.mxu0 %vm355_vm3, %v1076_v13  ;;  %vm344_vm14 = vcmp.eq.s32.totalorder %v324_v22, %v1343_v10  ;;  %vm343_vm15 = vcmp.eq.s32.totalorder %v323_v23, %v1343_v10  ;;  %vm342_vm0 = vcmp.eq.s32.totalorder %v322_v24, %v1343_v10  ;;  %vm341_vm1 = vcmp.eq.s32.totalorder %v1338_v6, %v1343_v10 }
  0x84   : > { %707 = vmatprep.subr.mxu0 %v1074_v3  ;;  %vm462_vm2 = vcmask 60416  }
  0x85   : > { %708 = vmatpush3.msk.msra.mxu0 %vm354_vm4, %v1076_v13 }
  0x86   : > { %709 = vmatprep.subr.mxu0 %v1074_v3 }
  0x87   : > { %710 = vmatpush3.msk.msra.mxu0 %vm353_vm5, %v1076_v13 }
  0x88   : > { %711 = vmatprep.subr.mxu0 %v1074_v3 }
  0x89   : > { %712 = vmatpush3.msk.msra.mxu0 %vm352_vm6, %v1076_v13 }
  0x8a   : > { %713 = vmatprep.subr.mxu0 %v1074_v3 }
  0x8b   : > { %714 = vmatpush3.msk.msra.mxu0 %vm351_vm7, %v1076_v13 }
  0x8c   : > { %715 = vmatprep.subr.mxu0 %v1074_v3 }
  0x8d   : > { %716 = vmatpush3.msk.msra.mxu0 %vm350_vm8, %v1076_v13 }
  0x8e   : > { %717 = vmatprep.subr.mxu0 %v1074_v3 }
  0x8f   : > { %718 = vmatpush3.msk.msra.mxu0 %vm349_vm9, %v1076_v13 }
  0x90   : > { %719 = vmatprep.subr.mxu0 %v1074_v3 }
  0x91   : > { %720 = vmatpush3.msk.msra.mxu0 %vm348_vm10, %v1076_v13 }
  0x92   : > { %721 = vmatprep.subr.mxu0 %v1074_v3 }
  0x93   : > { %722 = vmatpush3.msk.msra.mxu0 %vm347_vm11, %v1076_v13 }
  0x94   : > { %723 = vmatprep.subr.mxu0 %v1074_v3 }
  0x95   : > { %724 = vmatpush3.msk.msra.mxu0 %vm346_vm12, %v1076_v13 }
  0x96   : > { %725 = vmatprep.subr.mxu0 %v1074_v3 }
  0x97   : > { %726 = vmatpush3.msk.msra.mxu0 %vm345_vm13, %v1076_v13 }
  0x98   : > { %727 = vmatprep.subr.mxu0 %v1074_v3 }
  0x99   : > { %728 = vmatpush3.msk.msra.mxu0 %vm344_vm14, %v1076_v13 }
  0x9a   : > { %729 = vmatprep.subr.mxu0 %v1074_v3 }
  0x9b   : > { %730 = vmatpush3.msk.msra.mxu0 %vm343_vm15, %v1076_v13 }
  0x9c   : > { %731 = vmatprep.subr.mxu0 %v1074_v3 }
  0x9d   : > { %732 = vmatpush3.msk.msra.mxu0 %vm342_vm0, %v1076_v13 }
  0x9e   : > { %733 = vmatprep.subr.mxu0 %v1074_v3 }
  0x9f   : > { %734 = vmatpush3.msk.msra.mxu0 %vm341_vm1, %v1076_v13 }
  0xa0   : > { %736 = vmatmul.mubr.f32.vlgmr.msra.gmra.mxu0 %v390_v25 }
 0x15f   : > { %467 = sbr.rel (%p682_p4) target bundleno = 585 (0x249), region = 56 }
 0x160   : > { %v457_v27 = vpop.f32.mrf.mxu0 }
 0x161   : > { %v461_v28 = vadd.f32 %v457_v27, %v389_v26 }
 0x162   : > { %v737_v29 = vpop.f32.mrf.mxu0 }
 0x163   : > { %463 = vst.msk [vmem:[#allocation2] sm:$0xf] %vm462_vm2, %v461_v28 }
 0x164   : > { %v469_v31 = vld [vmem:[%s1319_s21] sm:$0xf]  ;;  %v479_v40 = vld [vmem:[%s309_s12] sm:$0x1]  ;;  %vm481_vm3 = vcmask 57344  }
 0x16a   : > { %v468_v30 = vld [vmem:[#allocation2] sm:$0xf] }
 0x16b   : > { %v470_v32 = vsub.f32 %v468_v30, %v469_v31 }
 0x16d   : > { %v471_v33 = vand.u32 2147483647, %v470_v32 }
 0x16f   : > { %v472_v34 = vsel %vm462_vm2, %v471_v33, 0.0 }
 0x170   : > { %v473_v35 = vrot.slane %v472_v34, 4 }
 0x172   : > { %v474_v36 = vadd.f32 %v473_v35, %v472_v34 }
 0x174   : > { %v475_v37 = vrot.slane %v474_v36, 2 }
 0x176   : > { %v476_v38 = vadd.f32 %v475_v37, %v474_v36 }
 0x178   : > { %v477_v39 = vrot.slane %v476_v38, 1 }
 0x17a   : > { %v478_v41 = vadd.f32 %v477_v39, %v476_v38 }
 0x17c   : > { %v480_v42 = vmul.f32 %v479_v40, %v478_v41 }
 0x17e   : > { %v482_v43 = vsel %vm481_vm3, %v480_v42, 0.0 }
 0x17f   : > { %483 = vadd.xlane.f32.xlu0 %v482_v43 }
 0x208   : > { %v484_v44 = vpop.xlane.xlu0 %483 }
 0x209   : > { %v485_v45 = vrot.slane %v484_v44, 4 }
 0x20b   : > { %v486_v46 = vadd.f32 %v485_v45, %v484_v44 }
 0x20d   : > { %v487_v47 = vrot.slane %v486_v46, 2 }
 0x20f   : > { %v488_v48 = vadd.f32 %v487_v47, %v486_v46 }
 0x211   : > { %v489_v49 = vrot.slane %v488_v48, 1 }
 0x213   : > { %v490_v50 = vadd.f32 %v489_v49, %v488_v48 }
 0x215   : > { %738 = vpush %v490_v50 }
 0x246   : > { %s739_s30 = spop %738 }
 0x247   : > { %v492_v51 = vstv %s739_s30 }
 0x248   : > { %493 = vst [vmem:[%s306_s27] sm:$0x1] %v492_v51 }
 0x249 PF: > { %s683_s5 = sshll.u32 %s1056_s22, 4  ;;  %s1495_s4 = sld [smem:[#allocation22_spill]] }
 0x24a   : > { %s507_s26 = sshll.u32 %s306_s27, 4  ;;  %s495_s1 = scalar_lea.sflag [#allocation5], %s1301_s8  ;;  %s508_s26 = int_to_ptr.vmem [resolvable:$true] %s507_s26 }
 0x24b   : > { %s940_s6 = scalar_lea.vmem %s508_s26, 16  ;;  %s1077_s23 = smov [#allocation9]  }
 0x24c   : > { %p941_p1 = scmp.ne.s32.totalorder %s508_s26, %s940_s6  ;;  %s944_s12 = sshll.u32 %s1077_s23, 4  ;;  %s945_s12 = int_to_ptr.vmem [resolvable:$false] %s944_s12 }
 0x24d   : > { %s946_s13 = scalar_lea.vmem %s945_s12, 32  ;;  %p947_p5 = scmp.lt.s32.totalorder %s508_s26, %s945_s12 }
 0x24e   : > { %p942_p10 = pnand %p941_p1, %p1255_p9  ;;  %p948_p8 = scmp.lt.s32.totalorder %s946_s13, %s940_s6 }
 0x24f   : > { %s505_s21 = scalar_lea.hbm %s1495_s4, %s683_s5 }
 0x250   : > { %p943_p6 = pneg %p942_p10  ;;  %p949_p0 = por %p948_p8, %p947_p5 }
 0x252   : > { %p950_p3 = pnand %p949_p0, %p943_p6 }
 0x254   : > { %953 = shalt.err (!%p950_p3)
}
 0x255   : > { %s954_s22 = scalar_lea.hbm %s505_s21, 16  ;;  %s958_s2 = scalar_lea.hbm %s1495_s4, 32 }
 0x256   : > { %p955_p11 = scmp.ne.s32.totalorder %s505_s21, %s954_s22  ;;  %p959_p2 = scmp.lt.s32.totalorder %s505_s21, %s1495_s4 }
 0x257   : > { %p960_p7 = scmp.lt.s32.totalorder %s958_s2, %s954_s22 }
 0x258   : > { %p956_p12 = pnand %p955_p11, %p1255_p9 }
 0x259   : > { %p961_p4 = por %p960_p7, %p959_p2 }
 0x25a   : > { %p957_p13 = pneg %p956_p12 }
 0x25c   : > { %p962_p1 = pnand %p961_p4, %p957_p13 }
 0x25e   : > { %965 = shalt.err (!%p962_p1)
}
 0x25f   : > { %746 = dma.vmem_to_hbm [thread:$0]  (%p1255_p9), %s508_s26, 16, %s505_s21, %s495_s1  }
 0x260 PF: > { %p763_p10 = scmp.ge.s32.totalorder %s1068_s25, 2  ;;  %s519_s10 = sand.u32 1, %s1040_s18  }
 0x261   : > { %p1496_p6 = scmp.ne.s32.totalorder %s1488_s14, 0  ;;  %s520_s20 = scalar_lea.sflag [#allocation5], %s519_s10 }
 0x263   : > { %p759_p5 = pnand %p763_p10, %p1496_p6 }
 0x265   : > { %p760_p8 = pneg %p759_p5 }
 0x267   : > { %1023 = dma.done.wait (%p760_p8), %s520_s20, 16  }
 0x268   : > { %1025 = vsyncadd (%p760_p8), %s520_s20, 4294967280  ;;  %s23_s25 = sadd.s32 1, %s1068_s25   ;;  %s1497_s7 = sld [smem:[#allocation14_spill]] }
 0x269   : > { %p20_p0 = scmp.ge.s32.totalorder %s23_s25, 6   ;;  %s1498_s20 = sld [smem:[#allocation19_spill]] }
 0x26a   : > { %s1499_s21 = sld [smem:[#allocation16_spill]]  ;;  %s1502_s15 = smov %s1032_s16 }
 0x26b   : > { %s1500_s23 = sld [smem:[#allocation17_spill]]  ;;  %s1503_s16 = smov %s1036_s17 }
 0x26c   : > { %s1501_s30 = sld [smem:[#allocation18_spill]]  ;;  %s1504_s17 = smov %s1196_s11 }
 0x26d   : > { %s1505_s18 = smov %s1044_s19  ;;  %s1507_s22 = smov %s1064_s24 }
 0x26e   : > { %s1506_s19 = smov %s1497_s7  ;;  %22 = sbr.rel (!%p20_p0) target bundleno = 15 (0xf), region = 116 }
 0x272   : > { %s1508_s24 = smov %s1501_s30 }
 0x273   :  { %524 = vsyncpa [#allocation4], 1 }
 0x274   :  { %526 = vsyncpa [#allocation4 + $0x1], 1 }
 0x275   :  { %527 = vsyncpa [#allocation7], 1 }
 0x276   :  { %529 = vsyncpa [#allocation7 + $0x1], 1 }
 0x277   :  { %530 = vsyncpa [#allocation5], 1 }
 0x278   :  { %532 = vsyncpa [#allocation5 + $0x1], 1 }

</bundles_post_ra>
